<compile_context>
chip_gen: v5e
topology: v5e:2x2
jax: 0.10.0
libtpu: 0.0.40
codegen_flags: <defaults>
</compile_context>

<pallas_src>
import functools

import jax
import jax.numpy as jnp
from jax.experimental import pallas as pl
from jax.experimental.pallas import tpu as pltpu

# Finite "-inf": exp underflows to exactly 0 for partially-masked rows (same
# result as -inf) but fully-masked rows give a uniform row instead of NaN.
_MASK_SENTINEL = -1e30


def _sdpa_kernel(*refs, scale, has_mask):
    if has_mask:
        mask_ref, q_ref, k_ref, v_ref, ctx_ref, attn_ref = refs
    else:
        q_ref, k_ref, v_ref, ctx_ref, attn_ref = refs

    q = q_ref[0]            # (TQ, D)  native dtype (bf16 stays bf16 for MXU)
    k = k_ref[0]            # (Lk, D)
    v = v_ref[0]            # (Lk, Dv)

    if scale is not None:
        # Fold scale into q: touches Lq*D elements instead of the Lq*Lk scores.
        q = q * jnp.asarray(scale, dtype=q.dtype)

    # scores = q @ k^T, contracting the trailing feature dim of both operands
    # directly (no explicit transpose through the XLU); f32 accumulation.
    s = jax.lax.dot_general(
        q, k,
        dimension_numbers=(((1,), (1,)), ((), ())),
        preferred_element_type=jnp.float32,
    )                                                    # (TQ, Lk) f32

    if has_mask:
        s = jnp.where(mask_ref[0] != 0, _MASK_SENTINEL, s)

    # softmax over keys (dim=2 of the (B, Lq, Lk) attention tensor)
    s_max = jnp.max(s, axis=-1, keepdims=True)
    e = jnp.exp(s - s_max)
    denom = jnp.sum(e, axis=-1, keepdims=True)
    attn = e * pl.reciprocal(denom, approx=True)         # EUP slot, VALU-free

    # TODO(synk): dropout with attention_dropout > 0.0 not implemented
    # (module default p=0.0 => identity, matching eval-mode semantics).

    ctx = jnp.dot(attn.astype(v.dtype), v, preferred_element_type=jnp.float32)

    attn_ref[0] = attn.astype(attn_ref.dtype)
    ctx_ref[0] = ctx.astype(ctx_ref.dtype)


def _pick_block_q(lq, cap):
    """Largest query tile <= cap that divides Lq (multiple of 8), else Lq."""
    if lq <= cap:
        return lq
    for c in (512, 256, 128, 64, 32, 16, 8):
        if c <= cap and lq % c == 0:
            return c
    return lq


def scaled_dot_product_attention(q, k, v, scale=None, attn_mask=None,
                                 block_q=None):
    """Pallas implementation of ScaledDotProductAttention.forward."""
    B, Lq, D = q.shape
    Bk, Lk, Dk = k.shape
    Bv, Lkv, Dv = v.shape
    assert B == Bk == Bv and D == Dk and Lk == Lkv

    has_mask = attn_mask is not None
    scale = scale if scale else None            # match torch's `if scale:`

    # VMEM-aware tile cap: v7x has 64 MiB physical VMEM, v5e/v6e 128 MiB.
    try:
        vmem_cap = int(pltpu.get_tpu_info().vmem_capacity_bytes)
    except Exception:
        vmem_cap = 64 * 1024 * 1024
    tq_cap = 512 if vmem_cap >= 96 * 1024 * 1024 else 256

    if block_q is None:
        TQ = _pick_block_q(Lq, tq_cap)
    else:
        TQ = int(block_q)
        assert Lq % TQ == 0 and (TQ == Lq or TQ % 8 == 0)
    n_q = Lq // TQ

    kernel = functools.partial(_sdpa_kernel, scale=scale, has_mask=has_mask)

    in_specs = []
    inputs = []
    if has_mask:
        # int8 mask: 4x less HBM/VMEM traffic than int32, tiled over Lq.
        inputs.append(attn_mask.astype(jnp.int8))
        in_specs.append(pl.BlockSpec((1, TQ, Lk), lambda b, i: (b, i, 0)))
    inputs += [q, k, v]
    in_specs += [
        pl.BlockSpec((1, TQ, D), lambda b, i: (b, i, 0)),
        pl.BlockSpec((1, Lk, D), lambda b, i: (b, 0, 0)),   # k keyed on b only
        pl.BlockSpec((1, Lk, Dv), lambda b, i: (b, 0, 0)),  # v keyed on b only
    ]

    out_dtype = q.dtype
    out_shapes = (
        jax.ShapeDtypeStruct((B, Lq, Dv), out_dtype),   # context
        jax.ShapeDtypeStruct((B, Lq, Lk), out_dtype),   # attention probs
    )
    out_specs = (
        pl.BlockSpec((1, TQ, Dv), lambda b, i: (b, i, 0)),
        pl.BlockSpec((1, TQ, Lk), lambda b, i: (b, i, 0)),
    )

    # Explicit VMEM budget from the (double-buffered) block sizes + f32 scratch.
    isz = lambda a: jnp.dtype(a.dtype).itemsize
    blk_bytes = (
        TQ * D * isz(q) + Lk * D * isz(k) + Lk * Dv * isz(v)
        + (TQ * Lk if has_mask else 0)
        + TQ * Dv * jnp.dtype(out_dtype).itemsize
        + TQ * Lk * jnp.dtype(out_dtype).itemsize
    )
    scratch_bytes = 4 * TQ * Lk * 4
    vmem_limit = int(min(vmem_cap - 8 * 1024 * 1024,
                         max(32 * 1024 * 1024,
                             int(1.5 * (2 * blk_bytes + scratch_bytes)))))

    context, attention = pl.pallas_call(
        kernel,
        out_shape=out_shapes,
        grid_spec=pltpu.PrefetchScalarGridSpec(
            num_scalar_prefetch=0,
            grid=(B, n_q),
            in_specs=in_specs,
            out_specs=out_specs,
        ),
        compiler_params=pltpu.CompilerParams(
            dimension_semantics=("parallel", "parallel"),
            vmem_limit_bytes=vmem_limit,
        ),
    )(*inputs)
    return context, attention


def _reference(q, k, v, scale=None, attn_mask=None):
    s = jnp.einsum("bqd,bkd->bqk", q.astype(jnp.float32), k.astype(jnp.float32))
    if scale:
        s = s * scale
    if attn_mask is not None:
        s = jnp.where(attn_mask, _MASK_SENTINEL, s)
    attn = jax.nn.softmax(s, axis=2)
    ctx = jnp.einsum("bqk,bkd->bqd", attn, v.astype(jnp.float32))
    return ctx.astype(q.dtype), attn.astype(q.dtype)


if __name__ == "__main__":
    key = jax.random.PRNGKey(0)
    kq, kk, kv = jax.random.split(key, 3)

    B, Lq, Lk, D, Dv = 2, 16, 8, 32, 32
    q = jax.random.normal(kq, (B, Lq, D), dtype=jnp.float32)
    k = jax.random.normal(kk, (B, Lk, D), dtype=jnp.float32)
    v = jax.random.normal(kv, (B, Lk, Dv), dtype=jnp.float32)
    scale = 1.0 / (D ** 0.5)

    # Unmasked path (single q-tile).
    ctx, attn = scaled_dot_product_attention(q, k, v, scale=scale)
    jax.block_until_ready((ctx, attn))
    ctx_ref, attn_ref = _reference(q, k, v, scale=scale)
    assert jnp.allclose(ctx, ctx_ref, atol=5e-3, rtol=5e-3)
    assert jnp.allclose(attn, attn_ref, atol=5e-3, rtol=5e-3)

    # Masked path, multi-tile over Lq (block_q=8 -> 2 query tiles per batch).
    mask = jnp.zeros((B, Lq, Lk), dtype=bool).at[:, :, -1].set(True)
    ctx_m, attn_m = scaled_dot_product_attention(q, k, v, scale=scale,
                                                 attn_mask=mask, block_q=8)
    jax.block_until_ready((ctx_m, attn_m))
    ctx_mr, attn_mr = _reference(q, k, v, scale=scale, attn_mask=mask)
    assert jnp.allclose(ctx_m, ctx_mr, atol=5e-3, rtol=5e-3)
    assert jnp.allclose(attn_m, attn_mr, atol=5e-3, rtol=5e-3)

    # bf16 path: operands stay bf16 into the MXU, f32 accumulation inside.
    qb, kb, vb = (x.astype(jnp.bfloat16) for x in (q, k, v))
    ctx_b, attn_b = scaled_dot_product_attention(qb, kb, vb, scale=scale)
    jax.block_until_ready((ctx_b, attn_b))
    ctx_br, attn_br = _reference(qb, kb, vb, scale=scale)
    assert ctx_b.dtype == jnp.bfloat16 and attn_b.dtype == jnp.bfloat16
    assert jnp.allclose(ctx_b.astype(jnp.float32), ctx_br.astype(jnp.float32),
                        atol=5e-2, rtol=5e-2)
    assert jnp.allclose(attn_b.astype(jnp.float32), attn_br.astype(jnp.float32),
                        atol=5e-2, rtol=5e-2)

    print("KERNEL_OK")
</pallas_src>

<mosaic_0001>
module attributes {stable_mosaic.version = 11 : i64} {
  func.func @_sdpa_kernel(%arg0: i32, %arg1: i32, %arg2: memref<1x16x32xf32, #tpu.memory_space<vmem>>, %arg3: memref<1x8x32xf32, #tpu.memory_space<vmem>>, %arg4: memref<1x8x32xf32, #tpu.memory_space<vmem>>, %arg5: memref<1x16x32xf32, #tpu.memory_space<vmem>>, %arg6: memref<1x16x8xf32, #tpu.memory_space<vmem>>) attributes {dimension_semantics = [#tpu.dimension_semantics<parallel>, #tpu.dimension_semantics<parallel>], iteration_bounds = array<i64: 2, 1>, scalar_prefetch = 0 : i64, scratch_operands = 0 : i64, tpu.core_type = #tpu.core_type<tc>, window_params = [{transform_indices = @transform_0, window_bounds = array<i64: 1, 16, 32>}, {transform_indices = @transform_1, window_bounds = array<i64: 1, 8, 32>}, {transform_indices = @transform_2, window_bounds = array<i64: 1, 8, 32>}, {transform_indices = @transform_3, window_bounds = array<i64: 1, 16, 32>}, {transform_indices = @transform_4, window_bounds = array<i64: 1, 16, 8>}]} {
    %c0 = arith.constant 0 : index
    %c0_0 = arith.constant 0 : index
    %c0_1 = arith.constant 0 : index
    %0 = vector.load %arg2[%c0, %c0_0, %c0_1] : memref<1x16x32xf32, #tpu.memory_space<vmem>>, vector<1x16x32xf32>
    %1 = vector.shape_cast %0 : vector<1x16x32xf32> to vector<16x32xf32>
    %c0_2 = arith.constant 0 : index
    %c0_3 = arith.constant 0 : index
    %c0_4 = arith.constant 0 : index
    %2 = vector.load %arg3[%c0_2, %c0_3, %c0_4] : memref<1x8x32xf32, #tpu.memory_space<vmem>>, vector<1x8x32xf32>
    %3 = vector.shape_cast %2 : vector<1x8x32xf32> to vector<8x32xf32>
    %c0_5 = arith.constant 0 : index
    %c0_6 = arith.constant 0 : index
    %c0_7 = arith.constant 0 : index
    %4 = vector.load %arg4[%c0_5, %c0_6, %c0_7] : memref<1x8x32xf32, #tpu.memory_space<vmem>>, vector<1x8x32xf32>
    %5 = vector.shape_cast %4 : vector<1x8x32xf32> to vector<8x32xf32>
    %cst = arith.constant 0.176776692 : f32
    %6 = vector.broadcast %cst : f32 to vector<16x32xf32>
    %7 = arith.mulf %1, %6 : vector<16x32xf32>
    %cst_8 = arith.constant dense<0.000000e+00> : vector<16x8xf32>
    %8 = tpu.matmul %7, %3, %cst_8 {dimension_numbers = #tpu.dot_dimension_numbers<[1], [1], [0], [0], [0, 0, 1, 0], [], []>} : vector<16x32xf32>, vector<8x32xf32>, vector<16x8xf32> -> vector<16x8xf32>
    %cst_9 = arith.constant dense<0xFF800000> : vector<16xf32>
    %9 = vector.multi_reduction <maximumf>, %8, %cst_9 [1] : vector<16x8xf32> to vector<16xf32>
    %10 = vector.shape_cast %9 : vector<16xf32> to vector<16x1xf32>
    %11 = vector.broadcast %10 : vector<16x1xf32> to vector<16x8xf32>
    %12 = arith.subf %8, %11 : vector<16x8xf32>
    %13 = math.exp %12 : vector<16x8xf32>
    %cst_10 = arith.constant dense<0.000000e+00> : vector<16xf32>
    %14 = vector.multi_reduction <add>, %13, %cst_10 [1] : vector<16x8xf32> to vector<16xf32>
    %15 = vector.shape_cast %14 : vector<16xf32> to vector<16x1xf32>
    %16 = tpu.reciprocal %15 {approx = true} : vector<16x1xf32> -> vector<16x1xf32>
    %17 = vector.broadcast %16 : vector<16x1xf32> to vector<16x8xf32>
    %18 = arith.mulf %13, %17 : vector<16x8xf32>
    %cst_11 = arith.constant dense<0.000000e+00> : vector<16x32xf32>
    %19 = tpu.matmul %18, %5, %cst_11 {dimension_numbers = #tpu.dot_dimension_numbers<[1], [0], [0], [1], [0, 0, 1, 1], [], []>} : vector<16x8xf32>, vector<8x32xf32>, vector<16x32xf32> -> vector<16x32xf32>
    %c0_12 = arith.constant 0 : index
    %c0_13 = arith.constant 0 : index
    %c0_14 = arith.constant 0 : index
    %20 = vector.load %arg6[%c0_12, %c0_13, %c0_14] : memref<1x16x8xf32, #tpu.memory_space<vmem>>, vector<1x16x8xf32>
    %21 = vector.shape_cast %20 : vector<1x16x8xf32> to vector<16x8xf32>
    %22 = vector.shape_cast %18 : vector<16x8xf32> to vector<1x16x8xf32>
    tpu.vector_store %arg6[%c0_12, %c0_13, %c0_14], %22 {strides = array<i32>} : memref<1x16x8xf32, #tpu.memory_space<vmem>>, vector<1x16x8xf32>,
    %c0_15 = arith.constant 0 : index
    %c0_16 = arith.constant 0 : index
    %c0_17 = arith.constant 0 : index
    %23 = vector.load %arg5[%c0_15, %c0_16, %c0_17] : memref<1x16x32xf32, #tpu.memory_space<vmem>>, vector<1x16x32xf32>
    %24 = vector.shape_cast %23 : vector<1x16x32xf32> to vector<16x32xf32>
    %25 = vector.shape_cast %19 : vector<16x32xf32> to vector<1x16x32xf32>
    tpu.vector_store %arg5[%c0_15, %c0_16, %c0_17], %25 {strides = array<i32>} : memref<1x16x32xf32, #tpu.memory_space<vmem>>, vector<1x16x32xf32>,
    return
  }
  func.func @transform_0(%arg0: i32, %arg1: i32) -> (i32, i32, i32) {
    %c0_i32 = arith.constant 0 : i32
    %c0_i32_0 = arith.constant 0 : i32
    return %arg0, %arg1, %c0_i32 : i32, i32, i32
  }
  func.func @transform_1(%arg0: i32, %arg1: i32) -> (i32, i32, i32) {
    %c0_i32 = arith.constant 0 : i32
    %c0_i32_0 = arith.constant 0 : i32
    %c0_i32_1 = arith.constant 0 : i32
    return %arg0, %c0_i32, %c0_i32_0 : i32, i32, i32
  }
  func.func @transform_2(%arg0: i32, %arg1: i32) -> (i32, i32, i32) {
    %c0_i32 = arith.constant 0 : i32
    %c0_i32_0 = arith.constant 0 : i32
    %c0_i32_1 = arith.constant 0 : i32
    return %arg0, %c0_i32, %c0_i32_0 : i32, i32, i32
  }
  func.func @transform_3(%arg0: i32, %arg1: i32) -> (i32, i32, i32) {
    %c0_i32 = arith.constant 0 : i32
    %c0_i32_0 = arith.constant 0 : i32
    return %arg0, %arg1, %c0_i32 : i32, i32, i32
  }
  func.func @transform_4(%arg0: i32, %arg1: i32) -> (i32, i32, i32) {
    %c0_i32 = arith.constant 0 : i32
    %c0_i32_0 = arith.constant 0 : i32
    return %arg0, %arg1, %c0_i32 : i32, i32, i32
  }
}

</mosaic_0001>

<bundles_post_ra>
// kernel: tpu_custom_call.1
= control target key start
LH: loop header
LB: loop body
LE: loop exit
PB: predicated region body
PF: predicated region fallthrough
CT: control target
= control target key end

     0   :  { %s1144_s0 = inlined_call_operand.hbm [shape: f32[2,16,32], index: 0, kind: input, shape index: {}]   ;;  %s1145_s1 = inlined_call_operand.hbm [shape: f32[2,8,32], index: 1, kind: input, shape index: {}]   ;;  %s1146_s2 = inlined_call_operand.hbm [shape: f32[2,8,32], index: 2, kind: input, shape index: {}]   ;;  %s1147_s3 = inlined_call_operand.hbm [shape: f32[2,16,32], index: 3, kind: output, shape index: {0}]   ;;  %s1148_s4 = inlined_call_operand.vmem [shape: f32[2,16,8], index: 4, kind: output, shape index: {1}]  }
   0x1   :  { %1154 = sst [smem:[#allocation16_spill]] %s1145_s1 }
   0x2   :  { %1155 = sst [smem:[#allocation17_spill]] %s1146_s2 }
   0x3   :  { %10 = vsyncpa [#allocation3], 0 }
   0x4   :  { %12 = vsyncpa [#allocation3 + $0x1], 0 }
   0x5   :  { %13 = vsyncpa [#allocation6], 0 }
   0x6   :  { %15 = vsyncpa [#allocation6 + $0x1], 0 }
   0x7   :  { %16 = vsyncpa [#allocation4], 0 }
   0x8   :  { %18 = vsyncpa [#allocation4 + $0x1], 0  ;;  %s954_s15 = smov 0   ;;  %s956_s16 = smov 0  }
   0x9   :  { %s958_s17 = smov 0   ;;  %s960_s18 = smov 0  }
   0xa   :  { %s962_s19 = smov 0   ;;  %s964_s20 = smov 0  }
   0xb LB: > { %1156 = sst [smem:[#allocation12_spill]] %s911_s17  ;;  %s985_s21 = sadd.s32 4294967295, %s923_s20   ;;  %s923_s20 = sphi %s964_s20, %s24_s20   ;;  %s919_s19 = sphi %s962_s19, %s1176_s19   ;;  %s915_s18 = sphi %s960_s18, %s1175_s18   ;;  %s911_s17 = sphi %s958_s17, %s1171_s17   ;;  %s907_s16 = sphi %s956_s16, %s1174_s16   ;;  %s903_s15 = sphi %s954_s15, %s1173_s15  }
   0xc   : > { %1157 = sst [smem:[#allocation13_spill]] %s923_s20  ;;  %s631_s22 = sadd.s32 4294967294, %s923_s20  }
   0xd   : > { %s36_s23 = sadd.s32 1, %s919_s19  ;;  %s45_s24 = sadd.s32 1, %s911_s17 }
   0xe   : > { %p38_p0 = scmp.ge.s32.totalorder %s36_s23, 2  ;;  %p52_p1 = scmp.ne.s32.totalorder %s911_s17, %s907_s16 }
   0xf   : > { %p53_p2 = scmp.eq.s32.totalorder %s923_s20, 0  ;;  %p58_p3 = scmp.ne.s32.totalorder %s907_s16, %s903_s15 }
  0x10   : > { %s1178_s23 = smov (%p38_p0, %s36_s23), 0  ;;  %p59_p5 = scmp.eq.s32.totalorder %s985_s21, 0 }
  0x11   : > { %1158 = sst [smem:[#allocation14_spill]] %s1178_s23  ;;  %p997_p4 = por %p53_p2, %p52_p1 }
  0x12   : > { %s40_s26 = ssub.s32 %s919_s19, %s1178_s23  ;;  %p136_p6 = scmp.eq.s32.totalorder %s985_s21, 1 }
  0x13   : > { %p43_p7 = scmp.eq.s32.totalorder %s40_s26, 0  ;;  %p1005_p8 = por %p59_p5, %p58_p3 }
  0x14   : > { %p1009_p9 = por %p136_p6, %p52_p1  ;;  %p142_p10 = scmp.eq.s32.totalorder %s631_s22, 1 }
  0x15   : > { %s1014_s29 = scalar_select %p43_p7, %s911_s17, %s45_s24  }
  0x16   : > { %p1016_p11 = por %p142_p10, %p58_p3  ;;  %p633_p12 = scmp.ge.s32.totalorder %s923_s20, 2 }
  0x17   : > { %1162 = sst [smem:[#allocation15_spill]] %s1014_s29  ;;  %p685_p13 = scmp.lt.s32.totalorder %s923_s20, 2 }
  0x18   : > { %s1023_s5 = sand.u32 1, %s911_s17   ;;  %s214_s6 = sand.u32 1, %s923_s20  }
  0x19   : > { %s1150_s7 = sshll.u32 %s1023_s5, 3  ;;  %p1029_p0 = pnand %p685_p13, %p997_p4 }
  0x1a   : > { %s638_s9 = sshll.u32 %s919_s19, 3  ;;  %s1165_s1 = sld [smem:[#allocation16_spill]] }
  0x1b   : > { %s218_s14 = scalar_lea.vmem [#allocation5], %s1150_s7  ;;  %s215_s24 = scalar_lea.sflag [#allocation6], %s214_s6 }
  0x1c   : > { %s226_s22 = sshll.u32 %s218_s14, 4  ;;  %s1166_s2 = sld [smem:[#allocation17_spill]]  ;;  %s227_s22 = int_to_ptr.vmem [resolvable:$true] %s226_s22 }
  0x1d   : > { %p641_p1 = scmp.ge.s32.totalorder %s923_s20, 1  ;;  %p250_p2 = scmp.lt.s32.totalorder %s923_s20, 3 }
  0x1e   : > { %s634_s11 = sshll.u32 %s1023_s5, 4  ;;  %s925_s25 = smov 128  }
  0x1f   : > { %p1046_p3 = pnand %p641_p1, %p250_p2  ;;  %s926_s26 = smov 8  }
  0x20   : > { %s222_s12 = scalar_lea.hbm %s1165_s1, %s638_s9  ;;  %s1168_s29 = sshll.u32 %s1023_s5, 3 }
  0x21   : > { %s224_s13 = sshll.u32 %s222_s12, 4  ;;  %s658_s12 = sshll.u32 %s919_s19, 4  ;;  %s225_s13 = int_to_ptr.hbm [resolvable:$true] %s224_s13 }
  0x22   : > { %677 = dma.hbm_to_vmem [thread:$0]  (!%p1029_p0), %s225_s13, 128, %s227_s22, %s215_s24  }
  0x23   : > { %s241_s23 = scalar_lea.hbm %s1166_s2, %s638_s9  ;;  %s201_s6 = scalar_lea.hbm %s1144_s0, %s658_s12 }
  0x24   : > { %s202_s13 = sshll.u32 %s201_s6, 4  ;;  %s194_s22 = scalar_lea.vmem [#allocation2], %s634_s11  ;;  %s203_s13 = int_to_ptr.hbm [resolvable:$true] %s202_s13 }
  0x25   : > { %s204_s1 = sshll.u32 %s194_s22, 4  ;;  %s191_s9 = scalar_lea.sflag [#allocation3], %s1023_s5  ;;  %s205_s1 = int_to_ptr.vmem [resolvable:$true] %s204_s1 }
  0x26   : > { %674 = dma.hbm_to_vmem [thread:$0]  (!%p1029_p0), %s203_s13, 256, %s205_s1, %s191_s9, %s925_s25, %s925_s25, %s926_s26  }
  0x27   : > { %s243_s2 = sshll.u32 %s241_s23, 4  ;;  %s237_s17 = scalar_lea.vmem [#allocation7], %s1168_s29  ;;  %s244_s2 = int_to_ptr.hbm [resolvable:$true] %s243_s2 }
  0x28   : > { %s245_s20 = sshll.u32 %s237_s17, 4  ;;  %254 = sbr.rel (%p1046_p3) target bundleno = 577 (0x241), region = 32  ;;  %s246_s20 = int_to_ptr.vmem [resolvable:$true] %s245_s20 }
  0x29   : > { %680 = dma.hbm_to_vmem [thread:$0]  (!%p1029_p0), %s244_s2, 128, %s246_s20, %s215_s24  }
  0x2a   : > { %s1065_s7 = sand.u32 (!%p1046_p3), 1, %s907_s16  }
  0x2b   : > { %s642_s11 = sshll.u32 (!%p1046_p3), %s1065_s7, 4  ;;  %s257_s1 = scalar_lea.sflag (!%p1046_p3), [#allocation3], %s1065_s7 }
  0x2c   : > { %s260_s23 = scalar_lea.vmem (!%p1046_p3), [#allocation2], %s642_s11 }
  0x2d   : > { %890 = dma.done.wait (%p1005_p8), %s257_s1, 256  }
  0x2e   : > { %892 = vsyncadd (%p1005_p8), %s257_s1, 4294967040  ;;  %s266_s2 = sand.u32 1, %s985_s21   ;;  %s643_s17 = sshll.u32 %s1065_s7, 3 }
  0x2f   : > { %s267_s20 = scalar_lea.sflag [#allocation6], %s266_s2  ;;  %s270_s29 = scalar_lea.vmem [#allocation5], %s643_s17 }
  0x30   : > { %894 = dma.done.wait (%p1005_p8), %s267_s20, 256  }
  0x31   : > { %896 = vsyncadd (%p1005_p8), %s267_s20, 4294967040  ;;  %vm343_vm0 = vcmask 261120   ;;  %v339_v0 = vld [vmem:[%s270_s29] sm:$0xff]  ;;  %v338_v1 = vld [vmem:[%s260_s23 + $0x8] sm:$0xff]  ;;  %vm376_vm1 = vcmask 64512   ;;  %s280_s21 = scalar_lea.vmem [#allocation7], %s643_s17 }
  0x32   : > { %v337_v2 = vld [vmem:[%s260_s23] sm:$0xff]  ;;  %661 = vmatpush.xpose.msk.msra.mxu2 %vm343_vm0, %v339_v0  ;;  %v342_v3 = vmul.f32 0.17677669, %v338_v1  ;;  %648 = vmatpush.xpose.msk.msra.mxu0 %vm343_vm0, %v339_v0  ;;  %v340_v19 = vld [vmem:[%s280_s21] sm:$0xff]  ;;  %p328_p4 = scmp.lt.s32.totalorder %s915_s18, 1  ;;  %s660_s12 = sshll.u32 %s915_s18, 4 }
  0x33   : > { %v341_v4 = vmul.f32 0.17677669, %v337_v2  ;;  %662 = vmatpush.msra.mxu3 %v340_v19  ;;  %420 = vmatpush.msra.mxu1 %v340_v19  ;;  %s455_s13 = scalar_lea.hbm %s1147_s3, %s660_s12  ;;  %s313_s22 = scalar_lea.vmem [#allocation8], %s642_s11 }
  0x34   : > { %s329_s27 = scalar_select %p328_p4, %s915_s18, 1 }
  0x35   : > { %650 = vmatmul.msk.f32.vlgmr.msra.gmra.mxu2 %vm343_vm0, %v342_v3  ;;  %649 = vmatmul.msk.f32.vlgmr.msra.gmra.mxu0 %vm343_vm0, %v341_v4  ;;  %s456_s9 = sshll.u32 %s313_s22, 4  ;;  %s458_s25 = sshll.u32 %s455_s13, 4  ;;  %s457_s9 = int_to_ptr.vmem [resolvable:$true] %s456_s9  ;;  %s459_s25 = int_to_ptr.hbm [resolvable:$true] %s458_s25 }
  0x36   : > { %s659_s5 = sshll.u32 %s329_s27, 4  ;;  %s433_s26 = scalar_lea.sflag [#allocation4], %s1065_s7 }
  0x37   : > { %s335_s10 = scalar_lea.vmem %s1148_s4, %s659_s5  ;;  %s851_s1 = sshra.s32 %s459_s25, 4  ;;  %s852_s1 = int_to_ptr.hbm [resolvable:$true] %s851_s1 }
  0x38   : > { %s853_s18 = scalar_lea.hbm %s852_s1, 16  ;;  %s857_s2 = scalar_lea.hbm %s1147_s3, 32 }
  0x39   : > { %p854_p5 = scmp.ne.s32.totalorder %s852_s1, %s853_s18  ;;  %p858_p8 = scmp.lt.s32.totalorder %s852_s1, %s1147_s3 }
  0x3a   : > { %p859_p10 = scmp.lt.s32.totalorder %s857_s2, %s853_s18 }
  0x3b   : > { %p855_p6 = pnand %p854_p5, %p1009_p9 }
  0x3c   : > { %p860_p13 = por %p859_p10, %p858_p8 }
  0x3d   : > { %p856_p7 = pneg %p855_p6 }
  0x3f   : > { %p861_p0 = pnand %p860_p13, %p856_p7 }
  0xb2   : > { %v370_v7 = vpop.f32.mrf.mxu0 }
  0xb3   : > { %v377_v8 = vsel %vm376_vm1, %v370_v7, -inf }
  0xb8   : > { %v373_v5 = vpop.f32.mrf.mxu2 }
  0xb9   : > { %v380_v6 = vsel %vm376_vm1, %v373_v5, -inf }
  0xba   : > { %381 = vmax.xlane.f32.xlu0 %v380_v6 }
  0xc2   : > { %378 = vmax.xlane.f32.xlu0 %v377_v8 }
 0x12d   : > { %v382_v9 = vpop.xlane.xlu0 %381 }
 0x12e   : > { %v384_v10 = vsub.f32 %v373_v5, %v382_v9 }
 0x130   : > { %v387_v11 = vmul.f32 1.442695, %v384_v10 }
 0x132   : > { %739 = vpow2.f32 %v387_v11 }
 0x135   : > { %v379_v12 = vpop.xlane.xlu0 %378 }
 0x136   : > { %v383_v13 = vsub.f32 %v370_v7, %v379_v12 }
 0x138   : > { %v740_v14 = vpop.eup %739  ;;  %v385_v15 = vmul.f32 1.442695, %v383_v13 }
 0x139   : > { %v392_v16 = vsel %vm376_vm1, %v740_v14, 0.0 }
 0x13a   : > { %741 = vpow2.f32 %v385_v15  ;;  %393 = vadd.xlane.f32.xlu1 %v392_v16 }
 0x140   : > { %v742_v17 = vpop.eup %741 }
 0x141   : > { %v389_v18 = vsel %vm376_vm1, %v742_v17, 0.0 }
 0x142   : > { %390 = vadd.xlane.f32.xlu1 %v389_v18 }
 0x1ad   : > { %v394_v20 = vpop.xlane.xlu1 %393 }
 0x1ae   : > { %743 = vrcp.f32 %v394_v20 }
 0x1b4   : > { %v744_v21 = vpop.eup %743 }
 0x1b5   : > { %v391_v22 = vpop.xlane.xlu1 %390  ;;  %v398_v23 = vmul.f32 %v744_v21, %v740_v14 }
 0x1b6   : > { %745 = vrcp.f32 %v391_v22 }
 0x1b7   : > { %652 = vmatmul.msk.f32.vlgmr.msra.gmra.mxu3 %vm376_vm1, %v398_v23  ;;  %429 = vst.msk [vmem:[%s335_s10 + $0x8] sm:$0xff] %vm376_vm1, %v398_v23 }
 0x1bc   : > { %v746_v24 = vpop.eup %745 }
 0x1bd   : > { %v397_v25 = vmul.f32 %v746_v24, %v742_v17 }
 0x1bf   : > { %651 = vmatmul.msk.f32.vlgmr.msra.gmra.mxu1 %vm376_vm1, %v397_v25  ;;  %428 = vst.msk [vmem:[%s335_s10] sm:$0xff] %vm376_vm1, %v397_v25 }
 0x23a   : > { %v425_v26 = vpop.f32.mrf.mxu3 }
 0x23b   : > { %431 = vst.msk [vmem:[%s313_s22 + $0x8] sm:$0xff] %vm343_vm0, %v425_v26 }
 0x23c   : > { %v422_v27 = vpop.f32.mrf.mxu1 }
 0x23d   : > { %430 = vst.msk [vmem:[%s313_s22] sm:$0xff] %vm343_vm0, %v422_v27 }
 0x23e   : > { %864 = shalt.err (!%p861_p0)
}
 0x23f   : > { %s927_s7 = smov 128   ;;  %s928_s29 = smov 8  }
 0x240   : > { %669 = dma.vmem_to_hbm [thread:$0]  (%p1009_p9), %s457_s9, 256, %s459_s25, %s433_s26, %s927_s7, %s927_s7, %s928_s29  }
 0x241 PF: > { %s1169_s21 = sld [smem:[#allocation13_spill]]  ;;  %s477_s27 = sand.u32 1, %s903_s15  }
 0x242   : > { %p682_p1 = pnand %p633_p12, %p1016_p11  ;;  %s478_s5 = scalar_lea.sflag [#allocation4], %s477_s27 }
 0x244   : > { %p683_p2 = pneg %p682_p1 }
 0x246   : > { %898 = dma.done.wait (%p683_p2), %s478_s5, 256  }
 0x247   : > { %900 = vsyncadd (%p683_p2), %s478_s5, 4294967040  ;;  %s24_s20 = sadd.s32 1, %s1169_s21   ;;  %s1170_s8 = sld [smem:[#allocation12_spill]] }
 0x248   : > { %p21_p3 = scmp.ge.s32.totalorder %s24_s20, 4   ;;  %s1171_s17 = sld [smem:[#allocation15_spill]] }
 0x249   : > { %s1172_s28 = sld [smem:[#allocation14_spill]]  ;;  %s1173_s15 = smov %s907_s16 }
 0x24a   : > { %s1175_s18 = smov %s919_s19 }
 0x24b   :  { %23 = sbr.rel (!%p21_p3) target bundleno = 11 (0xb), region = 113 }
 0x24d   : > { %s1174_s16 = smov %s1170_s8 }
 0x24f   : > { %s1176_s19 = smov %s1172_s28 }
 0x250   :  { %496 = vsyncpa [#allocation3], 1 }
 0x251   :  { %498 = vsyncpa [#allocation3 + $0x1], 1 }
 0x252   :  { %499 = vsyncpa [#allocation6], 1 }
 0x253   :  { %501 = vsyncpa [#allocation6 + $0x1], 1 }
 0x254   :  { %502 = vsyncpa [#allocation4], 1 }
 0x255   :  { %504 = vsyncpa [#allocation4 + $0x1], 1 }

</bundles_post_ra>
